<compile_context>
chip_gen: v5e
topology: v5e:2x2
jax: 0.10.0
libtpu: 0.0.40
codegen_flags: <defaults>
</compile_context>

<pallas_src>
import numpy as np
import jax
import jax.numpy as jnp
from jax.experimental import pallas as pl
from jax.experimental.pallas import tpu as pltpu


# ----------------------------------------------------------------------------
# Python glue: tree walk (identical semantics to get_lextree_encs_gcn)
# ----------------------------------------------------------------------------
def get_lextree_encs(lextree, embeddings, adjacency, wordpiece=None):
    if lextree[1] != -1 and wordpiece is not None:
        idx = len(embeddings)
        embeddings.append(wordpiece)
        adjacency.append([idx])
        return idx
    elif lextree[1] == -1 and lextree[0] != {}:
        ids = []
        idx = len(embeddings)
        if wordpiece is not None:
            embeddings.append(wordpiece)
        for newpiece, values in lextree[0].items():
            ids.append(get_lextree_encs(values, embeddings, adjacency, newpiece))
        if wordpiece is not None:
            adjacency.append([idx] + ids)
        return idx


# ----------------------------------------------------------------------------
# Pallas kernel: all GCN layers fused into one grid step
# ----------------------------------------------------------------------------
def make_gcn_kernel(nlayer: int, residual: bool, d_real: int):
    # Python scalars only (jnp scalar constants would be captured-array errors).
    inv_d = 1.0 / float(d_real)
    eps = 1e-5

    def kernel(a_ref, x_ref, w_ref, p_ref, o_ref):
        # Raw 0/1 adjacency (bf16, exact). Symmetric normalization is fused here:
        # D^-1/2 A D^-1/2 @ L == dis * (A @ (dis * L)), so the normalized (N,N)
        # matrix is never built. Zero-degree guard (reference would give NaN for
        # isolated nodes; benign here since every tree node has a self-edge).
        a = a_ref[...]                                                   # bf16 (Np,Np)
        deg = jnp.sum(a.astype(jnp.float32), axis=-1, keepdims=True)    # (Np,1) f32
        dis = jnp.where(deg > 0.0, jax.lax.rsqrt(deg), 0.0)             # (Np,1) f32

        h = x_ref[...]                                                   # f32 (Np,Dp)

        # TODO(synk): for large biasing trees / big nlayer, switch this static
        # unroll to lax.fori_loop with a streamed per-layer W (and add a row-block
        # "parallel" grid axis over nodes to use v7x's second TensorCore).
        for i in range(nlayer):
            params = p_ref[i]                       # f32 (8, Dp): bias/gamma/beta (+pad)
            w = w_ref[i]                            # bf16 (Dp, Dp)
            lin = jnp.dot(h.astype(jnp.bfloat16), w,
                          preferred_element_type=jnp.float32) + params[0:1, :]
            z = jnp.dot(a, (dis * lin).astype(jnp.bfloat16),
                        preferred_element_type=jnp.float32)
            z = jnp.maximum(dis * z, 0.0)           # relu(dis*x) == dis*relu(x), dis>=0
            if residual:
                # i == 0: residual is the first layer's linear output; i > 0: prev H.
                prev = lin if i == 0 else h
                s = z + prev
                # Padded feature columns of s are exactly 0, so unmasked sums over
                # Dp give the statistics over the real D columns.
                mu = jnp.sum(s, axis=-1, keepdims=True) * inv_d
                var = jnp.maximum(
                    jnp.sum(s * s, axis=-1, keepdims=True) * inv_d - mu * mu, 0.0)
                h = (s - mu) * jax.lax.rsqrt(var + eps) * params[1:2, :] + params[2:3, :]
            else:
                h = z

        o_ref[...] = h

    return kernel


def gcn_forward_pallas(A, X, Ws, bs, gammas, betas, *, residual: bool):
    N, D = X.shape
    nlayer = Ws.shape[0]

    SUB, LANE = 16, 128                               # 16 sublanes: clean bf16 packing
    Np = max(SUB, ((N + SUB - 1) // SUB) * SUB)
    Dp = max(LANE, ((D + LANE - 1) // LANE) * LANE)   # lane-dense feature dim

    # Zero-padding keeps padded feature columns exactly zero through every layer.
    A_pad = jnp.pad(A.astype(jnp.float32), ((0, Np - N), (0, Np - N))).astype(jnp.bfloat16)
    X_pad = jnp.pad(X.astype(jnp.float32), ((0, Np - N), (0, Dp - D)))
    W_pad = jnp.pad(Ws.astype(jnp.float32),
                    ((0, 0), (0, Dp - D), (0, Dp - D))).astype(jnp.bfloat16)
    P = jnp.stack([bs, gammas, betas], axis=1).astype(jnp.float32)      # (nlayer,3,D)
    P_pad = jnp.pad(P, ((0, 0), (0, 8 - 3), (0, Dp - D)))               # (nlayer,8,Dp)

    # VMEM budget from the real footprint (x2 for default double-buffering).
    footprint = (Np * Np * 2 + Np * Dp * 4 + nlayer * Dp * Dp * 2
                 + nlayer * 8 * Dp * 4 + Np * Dp * 4)
    vmem_limit = int(min(max(2 * footprint + (4 << 20), 32 << 20), 64 << 20))
    # TODO(synk): mark grid-invariant inputs pipeline_mode=pl.Buffered(1) to drop
    # the redundant second buffer once that path is exercised on all targets.

    out = pl.pallas_call(
        make_gcn_kernel(nlayer, residual, D),
        out_shape=jax.ShapeDtypeStruct((Np, Dp), jnp.float32),
        grid_spec=pltpu.PrefetchScalarGridSpec(
            num_scalar_prefetch=0,
            grid=(1,),
            in_specs=[
                pl.BlockSpec((Np, Np), lambda i: (0, 0)),             # raw adjacency (bf16)
                pl.BlockSpec((Np, Dp), lambda i: (0, 0)),             # X (initial H, f32)
                pl.BlockSpec((nlayer, Dp, Dp), lambda i: (0, 0, 0)),  # stacked W (bf16)
                pl.BlockSpec((nlayer, 8, Dp), lambda i: (0, 0, 0)),   # stacked b/gamma/beta
            ],
            out_specs=pl.BlockSpec((Np, Dp), lambda i: (0, 0)),
        ),
        compiler_params=pltpu.CompilerParams(
            dimension_semantics=("arbitrary",),
            vmem_limit_bytes=vmem_limit,
        ),
        input_output_aliases={1: 0},   # X buffer reused for the output
    )(A_pad, X_pad, W_pad, P_pad)

    return out[:N, :D]


gcn_forward = jax.jit(gcn_forward_pallas, static_argnames=("residual",))


# ----------------------------------------------------------------------------
# Pure-JAX f32 reference (mirrors forward_gcn, eval mode, nhead=1)
# ----------------------------------------------------------------------------
def gcn_forward_ref(A, X, Ws, bs, gammas, betas, residual: bool):
    deg = A.sum(-1)
    d = deg ** (-0.5)
    An = (d[:, None] * A) * d[None, :]
    H = X
    for i in range(Ws.shape[0]):
        lin = H @ Ws[i] + bs[i]
        Z = jnp.maximum(An @ lin, 0.0)
        if residual:
            prev = lin if i == 0 else H
            S = Z + prev
            mu = S.mean(-1, keepdims=True)
            var = ((S - mu) ** 2).mean(-1, keepdims=True)
            H = (S - mu) / jnp.sqrt(var + 1e-5) * gammas[i] + betas[i]
        else:
            H = Z
    return H


if __name__ == "__main__":
    # --- config (small, consistent with the module) -------------------------
    embdim = 32
    treehid = 32            # == embdim so all layers share a stacked (D, D) weight
    nlayer = 3
    residual = True
    nhead = 1               # TODO(synk): nhead>1 concatenates per-layer outputs (pure glue)
    vocab = 16

    # --- synthetic prefix tree: [children_dict, value] -----------------------
    prefixtree = [
        {
            1: [{2: [{}, 10], 3: [{}, 11]}, -1],
            4: [{}, 12],
        },
        -1,
    ]
    embeddings, adjacency = [], []
    get_lextree_encs(prefixtree, embeddings, adjacency)
    n_nodes = len(embeddings)

    A_np = np.zeros((n_nodes, n_nodes), dtype=np.float32)
    for node in adjacency:
        for nb in node:
            A_np[node[0], nb] = 1.0

    # --- deterministic parameter init ----------------------------------------
    key = jax.random.PRNGKey(0)
    k_emb, k_w, k_b = jax.random.split(key, 3)
    decemb_weight = jax.random.normal(k_emb, (vocab, embdim), jnp.float32)
    Ws = 0.1 * jax.random.normal(k_w, (nlayer, treehid, treehid), jnp.float32)
    bs = 0.1 * jax.random.normal(k_b, (nlayer, treehid), jnp.float32)
    gammas = jnp.ones((nlayer, treehid), jnp.float32)   # torch LayerNorm default init
    betas = jnp.zeros((nlayer, treehid), jnp.float32)

    # nodes_encs = decemb.weight[embeddings]  (embedding gather, glue)
    X = decemb_weight[jnp.array(embeddings, dtype=jnp.int32)]
    A = jnp.asarray(A_np)

    # --- run kernel + check --------------------------------------------------
    out = gcn_forward(A, X, Ws, bs, gammas, betas, residual=residual)
    out = jax.block_until_ready(out)

    ref = gcn_forward_ref(A, X, Ws, bs, gammas, betas, residual)
    # bf16 MXU path -> looser tolerance than the previous all-f32 version.
    np.testing.assert_allclose(np.asarray(out), np.asarray(ref), rtol=2e-2, atol=3e-2)
    print("KERNEL_OK")
</pallas_src>

<mosaic_0001>
module attributes {stable_mosaic.version = 11 : i64} {
  func.func @kernel(%arg0: i32, %arg1: memref<16x16xbf16, #tpu.memory_space<vmem>>, %arg2: memref<16x128xf32, #tpu.memory_space<vmem>>, %arg3: memref<3x128x128xbf16, #tpu.memory_space<vmem>>, %arg4: memref<3x8x128xf32, #tpu.memory_space<vmem>>, %arg5: memref<16x128xf32, #tpu.memory_space<vmem>>) attributes {dimension_semantics = [#tpu.dimension_semantics<arbitrary>], iteration_bounds = array<i64: 1>, scalar_prefetch = 0 : i64, scratch_operands = 0 : i64, tpu.core_type = #tpu.core_type<tc>, window_params = [{pipeline_mode = #tpu.pipeline_mode<synchronous>, transform_indices = @transform_0, window_bounds = array<i64: 16, 16>}, {pipeline_mode = #tpu.pipeline_mode<synchronous>, transform_indices = @transform_1, window_bounds = array<i64: 16, 128>}, {pipeline_mode = #tpu.pipeline_mode<synchronous>, transform_indices = @transform_2, window_bounds = array<i64: 3, 128, 128>}, {pipeline_mode = #tpu.pipeline_mode<synchronous>, transform_indices = @transform_3, window_bounds = array<i64: 3, 8, 128>}, {pipeline_mode = #tpu.pipeline_mode<synchronous>, transform_indices = @transform_4, window_bounds = array<i64: 16, 128>}]} {
    %c0 = arith.constant 0 : index
    %c0_0 = arith.constant 0 : index
    %0 = vector.load %arg1[%c0, %c0_0] : memref<16x16xbf16, #tpu.memory_space<vmem>>, vector<16x16xbf16>
    %1 = arith.extf %0 : vector<16x16xbf16> to vector<16x16xf32>
    %cst = arith.constant dense<0.000000e+00> : vector<16xf32>
    %2 = vector.multi_reduction <add>, %1, %cst [1] : vector<16x16xf32> to vector<16xf32>
    %3 = vector.shape_cast %2 : vector<16xf32> to vector<16x1xf32>
    %cst_1 = arith.constant 0.000000e+00 : f32
    %4 = vector.broadcast %cst_1 : f32 to vector<16x1xf32>
    %5 = arith.cmpf ogt, %3, %4 : vector<16x1xf32>
    %6 = math.rsqrt %3 : vector<16x1xf32>
    %cst_2 = arith.constant 0.000000e+00 : f32
    %7 = vector.broadcast %cst_2 : f32 to vector<16x1xf32>
    %8 = arith.select %5, %6, %7 : vector<16x1xi1>, vector<16x1xf32>
    %c0_3 = arith.constant 0 : index
    %c0_4 = arith.constant 0 : index
    %9 = vector.load %arg2[%c0_3, %c0_4] : memref<16x128xf32, #tpu.memory_space<vmem>>, vector<16x128xf32>
    %c0_5 = arith.constant 0 : index
    %c0_6 = arith.constant 0 : index
    %c0_7 = arith.constant 0 : index
    %10 = vector.load %arg4[%c0_5, %c0_6, %c0_7] : memref<3x8x128xf32, #tpu.memory_space<vmem>>, vector<1x8x128xf32>
    %11 = vector.shape_cast %10 : vector<1x8x128xf32> to vector<8x128xf32>
    %c0_8 = arith.constant 0 : index
    %c0_9 = arith.constant 0 : index
    %c0_10 = arith.constant 0 : index
    %12 = vector.load %arg3[%c0_8, %c0_9, %c0_10] : memref<3x128x128xbf16, #tpu.memory_space<vmem>>, vector<1x128x128xbf16>
    %13 = vector.shape_cast %12 : vector<1x128x128xbf16> to vector<128x128xbf16>
    %14 = arith.truncf %9 : vector<16x128xf32> to vector<16x128xbf16>
    %cst_11 = arith.constant dense<0.000000e+00> : vector<16x128xf32>
    %15 = tpu.matmul %14, %13, %cst_11 {dimension_numbers = #tpu.dot_dimension_numbers<[1], [0], [0], [1], [0, 0, 1, 1], [], []>} : vector<16x128xbf16>, vector<128x128xbf16>, vector<16x128xf32> -> vector<16x128xf32>
    %16 = vector.extract_strided_slice %11 {offsets = [0, 0], sizes = [1, 128], strides = [1, 1]} : vector<8x128xf32> to vector<1x128xf32>
    %17 = vector.broadcast %16 : vector<1x128xf32> to vector<16x128xf32>
    %18 = arith.addf %15, %17 : vector<16x128xf32>
    %19 = vector.broadcast %8 : vector<16x1xf32> to vector<16x128xf32>
    %20 = arith.mulf %19, %18 : vector<16x128xf32>
    %21 = arith.truncf %20 : vector<16x128xf32> to vector<16x128xbf16>
    %cst_12 = arith.constant dense<0.000000e+00> : vector<16x128xf32>
    %22 = tpu.matmul %0, %21, %cst_12 {dimension_numbers = #tpu.dot_dimension_numbers<[1], [0], [0], [1], [0, 0, 1, 1], [], []>} : vector<16x16xbf16>, vector<16x128xbf16>, vector<16x128xf32> -> vector<16x128xf32>
    %23 = vector.broadcast %8 : vector<16x1xf32> to vector<16x128xf32>
    %24 = arith.mulf %23, %22 : vector<16x128xf32>
    %cst_13 = arith.constant 0.000000e+00 : f32
    %25 = vector.broadcast %cst_13 : f32 to vector<16x128xf32>
    %26 = arith.maximumf %24, %25 : vector<16x128xf32>
    %27 = arith.addf %26, %18 : vector<16x128xf32>
    %cst_14 = arith.constant dense<0.000000e+00> : vector<16xf32>
    %28 = vector.multi_reduction <add>, %27, %cst_14 [1] : vector<16x128xf32> to vector<16xf32>
    %29 = vector.shape_cast %28 : vector<16xf32> to vector<16x1xf32>
    %cst_15 = arith.constant 3.125000e-02 : f32
    %30 = vector.broadcast %cst_15 : f32 to vector<16x1xf32>
    %31 = arith.mulf %29, %30 : vector<16x1xf32>
    %32 = arith.mulf %27, %27 : vector<16x128xf32>
    %cst_16 = arith.constant dense<0.000000e+00> : vector<16xf32>
    %33 = vector.multi_reduction <add>, %32, %cst_16 [1] : vector<16x128xf32> to vector<16xf32>
    %34 = vector.shape_cast %33 : vector<16xf32> to vector<16x1xf32>
    %cst_17 = arith.constant 3.125000e-02 : f32
    %35 = vector.broadcast %cst_17 : f32 to vector<16x1xf32>
    %36 = arith.mulf %34, %35 : vector<16x1xf32>
    %37 = arith.mulf %31, %31 : vector<16x1xf32>
    %38 = arith.subf %36, %37 : vector<16x1xf32>
    %cst_18 = arith.constant 0.000000e+00 : f32
    %39 = vector.broadcast %cst_18 : f32 to vector<16x1xf32>
    %40 = arith.maximumf %38, %39 : vector<16x1xf32>
    %41 = vector.broadcast %31 : vector<16x1xf32> to vector<16x128xf32>
    %42 = arith.subf %27, %41 : vector<16x128xf32>
    %cst_19 = arith.constant 9.99999974E-6 : f32
    %43 = vector.broadcast %cst_19 : f32 to vector<16x1xf32>
    %44 = arith.addf %40, %43 : vector<16x1xf32>
    %45 = math.rsqrt %44 : vector<16x1xf32>
    %46 = vector.broadcast %45 : vector<16x1xf32> to vector<16x128xf32>
    %47 = arith.mulf %42, %46 : vector<16x128xf32>
    %48 = vector.extract_strided_slice %11 {offsets = [1, 0], sizes = [1, 128], strides = [1, 1]} : vector<8x128xf32> to vector<1x128xf32>
    %49 = vector.broadcast %48 : vector<1x128xf32> to vector<16x128xf32>
    %50 = arith.mulf %47, %49 : vector<16x128xf32>
    %51 = vector.extract_strided_slice %11 {offsets = [2, 0], sizes = [1, 128], strides = [1, 1]} : vector<8x128xf32> to vector<1x128xf32>
    %52 = vector.broadcast %51 : vector<1x128xf32> to vector<16x128xf32>
    %53 = arith.addf %50, %52 : vector<16x128xf32>
    %c1 = arith.constant 1 : index
    %c0_20 = arith.constant 0 : index
    %c0_21 = arith.constant 0 : index
    %54 = vector.load %arg4[%c1, %c0_20, %c0_21] : memref<3x8x128xf32, #tpu.memory_space<vmem>>, vector<1x8x128xf32>
    %55 = vector.shape_cast %54 : vector<1x8x128xf32> to vector<8x128xf32>
    %c1_22 = arith.constant 1 : index
    %c0_23 = arith.constant 0 : index
    %c0_24 = arith.constant 0 : index
    %56 = vector.load %arg3[%c1_22, %c0_23, %c0_24] : memref<3x128x128xbf16, #tpu.memory_space<vmem>>, vector<1x128x128xbf16>
    %57 = vector.shape_cast %56 : vector<1x128x128xbf16> to vector<128x128xbf16>
    %58 = arith.truncf %53 : vector<16x128xf32> to vector<16x128xbf16>
    %cst_25 = arith.constant dense<0.000000e+00> : vector<16x128xf32>
    %59 = tpu.matmul %58, %57, %cst_25 {dimension_numbers = #tpu.dot_dimension_numbers<[1], [0], [0], [1], [0, 0, 1, 1], [], []>} : vector<16x128xbf16>, vector<128x128xbf16>, vector<16x128xf32> -> vector<16x128xf32>
    %60 = vector.extract_strided_slice %55 {offsets = [0, 0], sizes = [1, 128], strides = [1, 1]} : vector<8x128xf32> to vector<1x128xf32>
    %61 = vector.broadcast %60 : vector<1x128xf32> to vector<16x128xf32>
    %62 = arith.addf %59, %61 : vector<16x128xf32>
    %63 = vector.broadcast %8 : vector<16x1xf32> to vector<16x128xf32>
    %64 = arith.mulf %63, %62 : vector<16x128xf32>
    %65 = arith.truncf %64 : vector<16x128xf32> to vector<16x128xbf16>
    %cst_26 = arith.constant dense<0.000000e+00> : vector<16x128xf32>
    %66 = tpu.matmul %0, %65, %cst_26 {dimension_numbers = #tpu.dot_dimension_numbers<[1], [0], [0], [1], [0, 0, 1, 1], [], []>} : vector<16x16xbf16>, vector<16x128xbf16>, vector<16x128xf32> -> vector<16x128xf32>
    %67 = vector.broadcast %8 : vector<16x1xf32> to vector<16x128xf32>
    %68 = arith.mulf %67, %66 : vector<16x128xf32>
    %cst_27 = arith.constant 0.000000e+00 : f32
    %69 = vector.broadcast %cst_27 : f32 to vector<16x128xf32>
    %70 = arith.maximumf %68, %69 : vector<16x128xf32>
    %71 = arith.addf %70, %53 : vector<16x128xf32>
    %cst_28 = arith.constant dense<0.000000e+00> : vector<16xf32>
    %72 = vector.multi_reduction <add>, %71, %cst_28 [1] : vector<16x128xf32> to vector<16xf32>
    %73 = vector.shape_cast %72 : vector<16xf32> to vector<16x1xf32>
    %cst_29 = arith.constant 3.125000e-02 : f32
    %74 = vector.broadcast %cst_29 : f32 to vector<16x1xf32>
    %75 = arith.mulf %73, %74 : vector<16x1xf32>
    %76 = arith.mulf %71, %71 : vector<16x128xf32>
    %cst_30 = arith.constant dense<0.000000e+00> : vector<16xf32>
    %77 = vector.multi_reduction <add>, %76, %cst_30 [1] : vector<16x128xf32> to vector<16xf32>
    %78 = vector.shape_cast %77 : vector<16xf32> to vector<16x1xf32>
    %cst_31 = arith.constant 3.125000e-02 : f32
    %79 = vector.broadcast %cst_31 : f32 to vector<16x1xf32>
    %80 = arith.mulf %78, %79 : vector<16x1xf32>
    %81 = arith.mulf %75, %75 : vector<16x1xf32>
    %82 = arith.subf %80, %81 : vector<16x1xf32>
    %cst_32 = arith.constant 0.000000e+00 : f32
    %83 = vector.broadcast %cst_32 : f32 to vector<16x1xf32>
    %84 = arith.maximumf %82, %83 : vector<16x1xf32>
    %85 = vector.broadcast %75 : vector<16x1xf32> to vector<16x128xf32>
    %86 = arith.subf %71, %85 : vector<16x128xf32>
    %cst_33 = arith.constant 9.99999974E-6 : f32
    %87 = vector.broadcast %cst_33 : f32 to vector<16x1xf32>
    %88 = arith.addf %84, %87 : vector<16x1xf32>
    %89 = math.rsqrt %88 : vector<16x1xf32>
    %90 = vector.broadcast %89 : vector<16x1xf32> to vector<16x128xf32>
    %91 = arith.mulf %86, %90 : vector<16x128xf32>
    %92 = vector.extract_strided_slice %55 {offsets = [1, 0], sizes = [1, 128], strides = [1, 1]} : vector<8x128xf32> to vector<1x128xf32>
    %93 = vector.broadcast %92 : vector<1x128xf32> to vector<16x128xf32>
    %94 = arith.mulf %91, %93 : vector<16x128xf32>
    %95 = vector.extract_strided_slice %55 {offsets = [2, 0], sizes = [1, 128], strides = [1, 1]} : vector<8x128xf32> to vector<1x128xf32>
    %96 = vector.broadcast %95 : vector<1x128xf32> to vector<16x128xf32>
    %97 = arith.addf %94, %96 : vector<16x128xf32>
    %c2 = arith.constant 2 : index
    %c0_34 = arith.constant 0 : index
    %c0_35 = arith.constant 0 : index
    %98 = vector.load %arg4[%c2, %c0_34, %c0_35] : memref<3x8x128xf32, #tpu.memory_space<vmem>>, vector<1x8x128xf32>
    %99 = vector.shape_cast %98 : vector<1x8x128xf32> to vector<8x128xf32>
    %c2_36 = arith.constant 2 : index
    %c0_37 = arith.constant 0 : index
    %c0_38 = arith.constant 0 : index
    %100 = vector.load %arg3[%c2_36, %c0_37, %c0_38] : memref<3x128x128xbf16, #tpu.memory_space<vmem>>, vector<1x128x128xbf16>
    %101 = vector.shape_cast %100 : vector<1x128x128xbf16> to vector<128x128xbf16>
    %102 = arith.truncf %97 : vector<16x128xf32> to vector<16x128xbf16>
    %cst_39 = arith.constant dense<0.000000e+00> : vector<16x128xf32>
    %103 = tpu.matmul %102, %101, %cst_39 {dimension_numbers = #tpu.dot_dimension_numbers<[1], [0], [0], [1], [0, 0, 1, 1], [], []>} : vector<16x128xbf16>, vector<128x128xbf16>, vector<16x128xf32> -> vector<16x128xf32>
    %104 = vector.extract_strided_slice %99 {offsets = [0, 0], sizes = [1, 128], strides = [1, 1]} : vector<8x128xf32> to vector<1x128xf32>
    %105 = vector.broadcast %104 : vector<1x128xf32> to vector<16x128xf32>
    %106 = arith.addf %103, %105 : vector<16x128xf32>
    %107 = vector.broadcast %8 : vector<16x1xf32> to vector<16x128xf32>
    %108 = arith.mulf %107, %106 : vector<16x128xf32>
    %109 = arith.truncf %108 : vector<16x128xf32> to vector<16x128xbf16>
    %cst_40 = arith.constant dense<0.000000e+00> : vector<16x128xf32>
    %110 = tpu.matmul %0, %109, %cst_40 {dimension_numbers = #tpu.dot_dimension_numbers<[1], [0], [0], [1], [0, 0, 1, 1], [], []>} : vector<16x16xbf16>, vector<16x128xbf16>, vector<16x128xf32> -> vector<16x128xf32>
    %111 = vector.broadcast %8 : vector<16x1xf32> to vector<16x128xf32>
    %112 = arith.mulf %111, %110 : vector<16x128xf32>
    %cst_41 = arith.constant 0.000000e+00 : f32
    %113 = vector.broadcast %cst_41 : f32 to vector<16x128xf32>
    %114 = arith.maximumf %112, %113 : vector<16x128xf32>
    %115 = arith.addf %114, %97 : vector<16x128xf32>
    %cst_42 = arith.constant dense<0.000000e+00> : vector<16xf32>
    %116 = vector.multi_reduction <add>, %115, %cst_42 [1] : vector<16x128xf32> to vector<16xf32>
    %117 = vector.shape_cast %116 : vector<16xf32> to vector<16x1xf32>
    %cst_43 = arith.constant 3.125000e-02 : f32
    %118 = vector.broadcast %cst_43 : f32 to vector<16x1xf32>
    %119 = arith.mulf %117, %118 : vector<16x1xf32>
    %120 = arith.mulf %115, %115 : vector<16x128xf32>
    %cst_44 = arith.constant dense<0.000000e+00> : vector<16xf32>
    %121 = vector.multi_reduction <add>, %120, %cst_44 [1] : vector<16x128xf32> to vector<16xf32>
    %122 = vector.shape_cast %121 : vector<16xf32> to vector<16x1xf32>
    %cst_45 = arith.constant 3.125000e-02 : f32
    %123 = vector.broadcast %cst_45 : f32 to vector<16x1xf32>
    %124 = arith.mulf %122, %123 : vector<16x1xf32>
    %125 = arith.mulf %119, %119 : vector<16x1xf32>
    %126 = arith.subf %124, %125 : vector<16x1xf32>
    %cst_46 = arith.constant 0.000000e+00 : f32
    %127 = vector.broadcast %cst_46 : f32 to vector<16x1xf32>
    %128 = arith.maximumf %126, %127 : vector<16x1xf32>
    %129 = vector.broadcast %119 : vector<16x1xf32> to vector<16x128xf32>
    %130 = arith.subf %115, %129 : vector<16x128xf32>
    %cst_47 = arith.constant 9.99999974E-6 : f32
    %131 = vector.broadcast %cst_47 : f32 to vector<16x1xf32>
    %132 = arith.addf %128, %131 : vector<16x1xf32>
    %133 = math.rsqrt %132 : vector<16x1xf32>
    %134 = vector.broadcast %133 : vector<16x1xf32> to vector<16x128xf32>
    %135 = arith.mulf %130, %134 : vector<16x128xf32>
    %136 = vector.extract_strided_slice %99 {offsets = [1, 0], sizes = [1, 128], strides = [1, 1]} : vector<8x128xf32> to vector<1x128xf32>
    %137 = vector.broadcast %136 : vector<1x128xf32> to vector<16x128xf32>
    %138 = arith.mulf %135, %137 : vector<16x128xf32>
    %139 = vector.extract_strided_slice %99 {offsets = [2, 0], sizes = [1, 128], strides = [1, 1]} : vector<8x128xf32> to vector<1x128xf32>
    %140 = vector.broadcast %139 : vector<1x128xf32> to vector<16x128xf32>
    %141 = arith.addf %138, %140 : vector<16x128xf32>
    %c0_48 = arith.constant 0 : index
    %c0_49 = arith.constant 0 : index
    %142 = vector.load %arg5[%c0_48, %c0_49] : memref<16x128xf32, #tpu.memory_space<vmem>>, vector<16x128xf32>
    tpu.vector_store %arg5[%c0_48, %c0_49], %141 {strides = array<i32>} : memref<16x128xf32, #tpu.memory_space<vmem>>, vector<16x128xf32>,
    return
  }
  func.func @transform_0(%arg0: i32) -> (i32, i32) {
    %c0_i32 = arith.constant 0 : i32
    %c0_i32_0 = arith.constant 0 : i32
    %c0_i32_1 = arith.constant 0 : i32
    return %c0_i32, %c0_i32_0 : i32, i32
  }
  func.func @transform_1(%arg0: i32) -> (i32, i32) {
    %c0_i32 = arith.constant 0 : i32
    %c0_i32_0 = arith.constant 0 : i32
    %c0_i32_1 = arith.constant 0 : i32
    return %c0_i32, %c0_i32_0 : i32, i32
  }
  func.func @transform_2(%arg0: i32) -> (i32, i32, i32) {
    %c0_i32 = arith.constant 0 : i32
    %c0_i32_0 = arith.constant 0 : i32
    %c0_i32_1 = arith.constant 0 : i32
    %c0_i32_2 = arith.constant 0 : i32
    return %c0_i32, %c0_i32_0, %c0_i32_1 : i32, i32, i32
  }
  func.func @transform_3(%arg0: i32) -> (i32, i32, i32) {
    %c0_i32 = arith.constant 0 : i32
    %c0_i32_0 = arith.constant 0 : i32
    %c0_i32_1 = arith.constant 0 : i32
    %c0_i32_2 = arith.constant 0 : i32
    return %c0_i32, %c0_i32_0, %c0_i32_1 : i32, i32, i32
  }
  func.func @transform_4(%arg0: i32) -> (i32, i32) {
    %c0_i32 = arith.constant 0 : i32
    %c0_i32_0 = arith.constant 0 : i32
    %c0_i32_1 = arith.constant 0 : i32
    return %c0_i32, %c0_i32_0 : i32, i32
  }
}

</mosaic_0001>

<bundles_post_ra>
// kernel: gcn_forward_pallas.1
= control target key start
LH: loop header
LB: loop body
LE: loop exit
PB: predicated region body
PF: predicated region fallthrough
CT: control target
= control target key end

     0   :  { %vm22_vm0 = vcmask 130048   ;;  %s908_s2 = inlined_call_operand.vmem [shape: bf16[3,128,128], index: 2, kind: input, shape index: {}]   ;;  %s909_s0 = inlined_call_operand.vmem [shape: bf16[16,16], index: 0, kind: input, shape index: {}]   ;;  %s910_s1 = inlined_call_operand.vmem [shape: f32[16,128], index: 1, kind: input, shape index: {}, may-alias: {1,4}]   ;;  %s911_s3 = inlined_call_operand.vmem [shape: f32[3,8,128], index: 3, kind: input, shape index: {}]   ;;  %s912_s4 = inlined_call_operand.vmem [shape: f32[16,128], index: 4, kind: output, shape index: {}, may-alias: {1,4}]  }
   0x1   :  { %v686_v0 = vld [vmem:[%s908_s2 + $0x38] sm:$0xff]  ;;  %v18_v1 = vld [vmem:[%s909_s0] sm:$0xff]   ;;  %v685_v3 = vld [vmem:[%s908_s2 + $0x30] sm:$0xff] }
   0x2   :  { %v20_v2 = vunpack.c.l.bf16 %v18_v1  ;;  %122 = vmatpush.bf16.msra.mxu0 %v686_v0  ;;  %v21_v5 = vunpack.c.h.bf16 %v18_v1  ;;  %v684_v6 = vld [vmem:[%s908_s2 + $0x28] sm:$0xff]  ;;  %v683_v8 = vld [vmem:[%s908_s2 + $0x20] sm:$0xff]  ;;  %v682_v9 = vld [vmem:[%s908_s2 + $0x18] sm:$0xff] }
   0x3   :  { %v681_v10 = vld [vmem:[%s908_s2 + $0x10] sm:$0xff]  ;;  %v680_v11 = vld [vmem:[%s908_s2 + $0x8] sm:$0xff]  ;;  %v679_v12 = vld [vmem:[%s908_s2] sm:$0xff] }
   0x4   :  { %v23_v4 = vsel %vm22_vm0, %v20_v2, 0.0  ;;  %v26_v7 = vsel %vm22_vm0, %v21_v5, 0.0  ;;  %v53_v13 = vld [vmem:[%s910_s1] sm:$0xff]  ;;  %v54_v14 = vld [vmem:[%s910_s1 + $0x8] sm:$0xff]  ;;  %v694_v54 = vld [vmem:[%s908_s2 + $0x78] sm:$0xff] }
   0x5   :  { %24 = vadd.xlane.f32.xlu0 %v23_v4  ;;  %v72_v15 = vpack.c.bf16 %v54_v14, %v53_v13  ;;  %v782_v28 = vld [vmem:[%s911_s3] sm:$0xff]  ;;  %288 = vmatpush.bf16.msra.mxu2 %v694_v54  ;;  %v693_v55 = vld [vmem:[%s908_s2 + $0x70] sm:$0xff]  ;;  %v692_v56 = vld [vmem:[%s908_s2 + $0x68] sm:$0xff] }
   0x6   :  { %123 = vmatpush.bf16.msra.mxu0 %v685_v3  ;;  %v73_v32 = vperm.slane %v782_v28, 0  ;;  %v794_v43 = vld [vmem:[%s909_s0] sm:$0xff]  ;;  %v690_v58 = vld [vmem:[%s908_s2 + $0x58] sm:$0xff]  ;;  %v689_v61 = vld [vmem:[%s908_s2 + $0x50] sm:$0xff] }
   0x7   :  { %v691_v57 = vld [vmem:[%s908_s2 + $0x60] sm:$0xff]  ;;  %v688_v1 = vld [vmem:[%s908_s2 + $0x48] sm:$0xff] }
   0x8   :  { %v687_v4 = vld [vmem:[%s908_s2 + $0x40] sm:$0xff] }
   0x9   :  { %289 = vmatpush.bf16.msra.mxu2 %v693_v55 }
   0xa   :  { %124 = vmatpush.bf16.msra.mxu0 %v684_v6 }
   0xd   :  { %27 = vadd.xlane.f32.xlu0 %v26_v7  ;;  %290 = vmatpush.bf16.msra.mxu2 %v692_v56 }
   0xe   :  { %125 = vmatpush.bf16.msra.mxu0 %v683_v8 }
  0x11   :  { %291 = vmatpush.bf16.msra.mxu2 %v691_v57 }
  0x12   :  { %126 = vmatpush.bf16.msra.mxu0 %v682_v9 }
  0x15   :  { %292 = vmatpush.bf16.msra.mxu2 %v690_v58 }
  0x16   :  { %127 = vmatpush.bf16.msra.mxu0 %v681_v10 }
  0x19   :  { %293 = vmatpush.bf16.msra.mxu2 %v689_v61  ;;  %v702_v61 = vld [vmem:[%s908_s2 + $0xb8] sm:$0xff] }
  0x1a   :  { %128 = vmatpush.bf16.msra.mxu0 %v680_v11 }
  0x1d   :  { %294 = vmatpush.bf16.msra.mxu2 %v688_v1  ;;  %v698_v1 = vld [vmem:[%s908_s2 + $0x98] sm:$0xff] }
  0x1e   :  { %129 = vmatpush.bf16.msra.mxu0 %v679_v12 }
  0x21   :  { %130 = vmatmul.bf16.vlgmr.msra.gmra.mxu0 %v72_v15  ;;  %295 = vmatpush.bf16.msra.mxu2 %v687_v4  ;;  %v697_v4 = vld [vmem:[%s908_s2 + $0x90] sm:$0xff] }
  0x78   :  { %v25_v16 = vpop.xlane.xlu0 %24 }
  0x79   :  { %703 = vrsqrt.f32 %v25_v16  ;;  %vm37_vm1 = vweird.f32 %v25_v16  ;;  %vm29_vm7 = vcmp.gt.f32.partialorder %v25_v16, 0.0 }
  0x7f   :  { %v704_v18 = vpop.eup %703 }
  0x80   :  { %v28_v17 = vpop.xlane.xlu0 %27  ;;  %v32_v20 = vmul.f32 %v704_v18, %v25_v16  ;;  %vm38_vm2 = vweird.f32 %v704_v18 }
  0x81   :  { %705 = vrsqrt.f32 %v28_v17  ;;  %vm47_vm3 = vweird.f32 %v28_v17  ;;  %vm39_vm5 = vmor %vm37_vm1, %vm38_vm2  ;;  %vm30_vm8 = vcmp.gt.f32.partialorder %v28_v17, 0.0 }
  0x82   :  { %v33_v22 = vmul.f32 %v704_v18, %v32_v20 }
  0x84   :  { %v34_v24 = vmul.f32 0.5, %v33_v22 }
  0x86   :  { %v35_v26 = vsub.f32 1.5, %v34_v24 }
  0x87   :  { %v706_v19 = vpop.eup %705 }
  0x88   :  { %v42_v21 = vmul.f32 %v706_v19, %v28_v17  ;;  %vm48_vm4 = vweird.f32 %v706_v19  ;;  %v36_v30 = vmul.f32 %v704_v18, %v35_v26 }
  0x89   :  { %vm49_vm6 = vmor %vm47_vm3, %vm48_vm4 }
  0x8a   :  { %v43_v23 = vmul.f32 %v706_v19, %v42_v21  ;;  %v40_v33 = vsel %vm39_vm5, %v704_v18, %v36_v30 }
  0x8b   :  { %v785_v38 = vsel %vm29_vm7, %v40_v33, 0.0 }
  0x8c   :  { %v44_v25 = vmul.f32 0.5, %v43_v23 }
  0x8e   :  { %v45_v27 = vsub.f32 1.5, %v44_v25 }
  0x90   :  { %v46_v31 = vmul.f32 %v706_v19, %v45_v27  ;;  %v213_v27 = vperm.slane %v782_v28, 1 }
  0x92   :  { %v50_v34 = vsel %vm49_vm6, %v706_v19, %v46_v31 }
  0x93   :  { %v787_v39 = vsel %vm30_vm8, %v50_v34, 0.0 }
  0x9e   :  { %v131_v29 = vpop.f32.mrf.mxu0 }
  0x9f   :  { %v132_v35 = vadd.f32 %v131_v29, %v73_v32 }
  0xa1   :  { %v136_v40 = vmul.f32 %v132_v35, %v785_v38 }
  0xa6   :  { %v133_v36 = vpop.f32.mrf.mxu0 }
  0xa7   :  { %v134_v37 = vadd.f32 %v133_v36, %v73_v32 }
  0xa9   :  { %v137_v41 = vmul.f32 %v134_v37, %v787_v39 }
  0xab   :  { %v138_v42 = vpack.c.bf16 %v137_v41, %v136_v40 }
  0xad   :  { %154 = vmatpush.bf16.msra.mxu1 %v138_v42  ;;  %v841_v42 = vld [vmem:[%s911_s3 + $0x8] sm:$0xff] }
  0xb0   :  { %577 = vmatmul.msk.bf16.vlgmr.msra.gmra.mxu1 %vm22_vm0, %v794_v43 }
  0xb1   :  { %446 = vmatpush.bf16.msrb.mxu1 %v702_v61 }
 0x12d   :  { %v156_v44 = vpop.f32.mrf.mxu1 }
 0x12e   :  { %v161_v45 = vmul.f32 %v156_v44, %v785_v38 }
 0x130   :  { %v163_v46 = vmax.f32 %v161_v45, 0.0  ;;  %v239_v45 = vperm.slane %v841_v42, 0 }
 0x132   :  { %v799_v47 = vadd.f32 %v163_v46, %v132_v35  ;;  %v216_v35 = vperm.slane %v782_v28, 2 }
 0x134   :  { %167 = vadd.xlane.f32.xlu1 %v799_v47  ;;  %v173_v48 = vmul.f32 %v799_v47, %v799_v47 }
 0x135   :  { %v158_v49 = vpop.f32.mrf.mxu1 }
 0x136   :  { %v162_v50 = vmul.f32 %v158_v49, %v787_v39  ;;  %175 = vadd.xlane.f32.xlu2 %v173_v48 }
 0x138   :  { %v164_v51 = vmax.f32 %v162_v50, 0.0 }
 0x13a   :  { %v805_v52 = vadd.f32 %v164_v51, %v134_v37 }
 0x13c   :  { %169 = vadd.xlane.f32.xlu1 %v805_v52  ;;  %v174_v53 = vmul.f32 %v805_v52, %v805_v52 }
 0x13e   :  { %177 = vadd.xlane.f32.xlu2 %v174_v53 }
 0x1a7   :  { %v168_v59 = vpop.xlane.xlu1 %167 }
 0x1a8   :  { %v171_v60 = vmul.f32 0.03125, %v168_v59 }
 0x1a9   :  { %v176_v62 = vpop.xlane.xlu2 %175 }
 0x1aa   :  { %v181_v63 = vmul.f32 %v171_v60, %v171_v60  ;;  %v179_v0 = vmul.f32 0.03125, %v176_v62  ;;  %v187_v25 = vsub.f32 %v799_v47, %v171_v60  ;;  %v701_v62 = vld [vmem:[%s908_s2 + $0xb0] sm:$0xff] }
 0x1ab   :  { %447 = vmatpush.bf16.msrb.mxu1 %v701_v62 }
 0x1ac   :  { %v183_v2 = vsub.f32 %v179_v0, %v181_v63  ;;  %v700_v63 = vld [vmem:[%s908_s2 + $0xa8] sm:$0xff]  ;;  %v699_v0 = vld [vmem:[%s908_s2 + $0xa0] sm:$0xff] }
 0x1ae   :  { %v185_v3 = vmax.f32 %v183_v2, 0.0 }
 0x1af   :  { %v170_v5 = vpop.xlane.xlu1 %169  ;;  %448 = vmatpush.bf16.msrb.mxu1 %v700_v63 }
 0x1b0   :  { %v189_v6 = vadd.f32 1e-05, %v185_v3  ;;  %v172_v7 = vmul.f32 0.03125, %v170_v5 }
 0x1b1   :  { %v178_v8 = vpop.xlane.xlu2 %177 }
 0x1b2   :  { %707 = vrsqrt.f32 %v189_v6  ;;  %v182_v9 = vmul.f32 %v172_v7, %v172_v7  ;;  %v180_v10 = vmul.f32 0.03125, %v178_v8  ;;  %vm197_vm10 = vweird.f32 %v189_v6  ;;  %v696_v8 = vld [vmem:[%s908_s2 + $0x88] sm:$0xff] }
 0x1b3   :  { %v188_v31 = vsub.f32 %v805_v52, %v172_v7  ;;  %449 = vmatpush.bf16.msrb.mxu1 %v699_v0 }
 0x1b4   :  { %v184_v11 = vsub.f32 %v180_v10, %v182_v9 }
 0x1b6   :  { %v186_v12 = vmax.f32 %v184_v11, 0.0  ;;  %v695_v11 = vld [vmem:[%s908_s2 + $0x80] sm:$0xff] }
 0x1b7   :  { %450 = vmatpush.bf16.msrb.mxu1 %v698_v1 }
 0x1b8   :  { %v708_v13 = vpop.eup %707  ;;  %v190_v15 = vadd.f32 1e-05, %v186_v12 }
 0x1b9   :  { %v192_v14 = vmul.f32 %v708_v13, %v189_v6  ;;  %vm198_vm9 = vweird.f32 %v708_v13 }
 0x1ba   :  { %709 = vrsqrt.f32 %v190_v15  ;;  %vm199_vm11 = vmor %vm197_vm10, %vm198_vm9  ;;  %vm207_vm13 = vweird.f32 %v190_v15 }
 0x1bb   :  { %v193_v16 = vmul.f32 %v708_v13, %v192_v14  ;;  %451 = vmatpush.bf16.msrb.mxu1 %v697_v4 }
 0x1bd   :  { %v194_v17 = vmul.f32 0.5, %v193_v16 }
 0x1bf   :  { %v195_v18 = vsub.f32 1.5, %v194_v17  ;;  %452 = vmatpush.bf16.msrb.mxu1 %v696_v8 }
 0x1c0   :  { %v710_v19 = vpop.eup %709 }
 0x1c1   :  { %v202_v20 = vmul.f32 %v710_v19, %v190_v15  ;;  %v196_v21 = vmul.f32 %v708_v13, %v195_v18  ;;  %vm208_vm12 = vweird.f32 %v710_v19 }
 0x1c2   :  { %vm209_vm14 = vmor %vm207_vm13, %vm208_vm12 }
 0x1c3   :  { %v203_v22 = vmul.f32 %v710_v19, %v202_v20  ;;  %v200_v24 = vsel %vm199_vm11, %v708_v13, %v196_v21  ;;  %453 = vmatpush.bf16.msrb.mxu1 %v695_v11 }
 0x1c4   :  { %v211_v29 = vmul.f32 %v200_v24, %v187_v25 }
 0x1c5   :  { %v204_v23 = vmul.f32 0.5, %v203_v22 }
 0x1c6   :  { %v214_v34 = vmul.f32 %v213_v27, %v211_v29 }
 0x1c7   :  { %v205_v26 = vsub.f32 1.5, %v204_v23 }
 0x1c8   :  { %v217_v37 = vadd.f32 %v216_v35, %v214_v34 }
 0x1c9   :  { %v206_v30 = vmul.f32 %v710_v19, %v205_v26 }
 0x1cb   :  { %v210_v32 = vsel %vm209_vm14, %v710_v19, %v206_v30 }
 0x1cc   :  { %v212_v33 = vmul.f32 %v210_v32, %v188_v31 }
 0x1ce   :  { %v215_v36 = vmul.f32 %v213_v27, %v212_v33 }
 0x1d0   :  { %v218_v40 = vadd.f32 %v216_v35, %v215_v36  ;;  %v371_v35 = vperm.slane %v841_v42, 1 }
 0x1d2   :  { %v238_v41 = vpack.c.bf16 %v218_v40, %v217_v37 }
 0x1d4   :  { %296 = vmatmul.bf16.vlgmr.msra.gmra.mxu2 %v238_v41 }
 0x257   :  { %v297_v44 = vpop.f32.mrf.mxu2 }
 0x258   :  { %v298_v46 = vadd.f32 %v297_v44, %v239_v45  ;;  %v374_v44 = vperm.slane %v841_v42, 2 }
 0x25a   :  { %v302_v49 = vmul.f32 %v298_v46, %v785_v38 }
 0x25f   :  { %v299_v47 = vpop.f32.mrf.mxu2 }
 0x260   :  { %v300_v48 = vadd.f32 %v299_v47, %v239_v45 }
 0x262   :  { %v303_v28 = vmul.f32 %v300_v48, %v787_v39 }
 0x264   :  { %v304_v50 = vpack.c.bf16 %v303_v28, %v302_v49 }
 0x266   :  { %312 = vmatpush.bf16.msra.mxu3 %v304_v50  ;;  %v891_v50 = vld [vmem:[%s911_s3 + $0x10] sm:$0xff] }
 0x269   :  { %627 = vmatmul.msk.bf16.vlgmr.msra.gmra.mxu3 %vm22_vm0, %v794_v43 }
 0x2ec   :  { %v314_v51 = vpop.f32.mrf.mxu3 }
 0x2ed   :  { %v319_v52 = vmul.f32 %v314_v51, %v785_v38 }
 0x2ef   :  { %v321_v53 = vmax.f32 %v319_v52, 0.0  ;;  %v397_v52 = vperm.slane %v891_v50, 0 }
 0x2f1   :  { %v849_v54 = vadd.f32 %v321_v53, %v217_v37 }
 0x2f3   :  { %325 = vadd.xlane.f32.xlu0 %v849_v54  ;;  %v331_v55 = vmul.f32 %v849_v54, %v849_v54 }
 0x2f4   :  { %v316_v56 = vpop.f32.mrf.mxu3 }
 0x2f5   :  { %v320_v57 = vmul.f32 %v316_v56, %v787_v39  ;;  %333 = vadd.xlane.f32.xlu2 %v331_v55 }
 0x2f7   :  { %v322_v58 = vmax.f32 %v320_v57, 0.0 }
 0x2f9   :  { %v855_v59 = vadd.f32 %v322_v58, %v218_v40 }
 0x2fb   :  { %327 = vadd.xlane.f32.xlu1 %v855_v59  ;;  %v332_v60 = vmul.f32 %v855_v59, %v855_v59 }
 0x2fd   :  { %335 = vadd.xlane.f32.xlu0 %v332_v60 }
 0x366   :  { %v326_v2 = vpop.xlane.xlu0 %325 }
 0x367   :  { %v329_v3 = vmul.f32 0.03125, %v326_v2 }
 0x368   :  { %v334_v5 = vpop.xlane.xlu2 %333 }
 0x369   :  { %v339_v6 = vmul.f32 %v329_v3, %v329_v3  ;;  %v337_v7 = vmul.f32 0.03125, %v334_v5  ;;  %v345_v33 = vsub.f32 %v849_v54, %v329_v3 }
 0x36b   :  { %v341_v9 = vsub.f32 %v337_v7, %v339_v6 }
 0x36d   :  { %v343_v10 = vmax.f32 %v341_v9, 0.0 }
 0x36e   :  { %v328_v12 = vpop.xlane.xlu1 %327 }
 0x36f   :  { %v347_v13 = vadd.f32 1e-05, %v343_v10  ;;  %v330_v14 = vmul.f32 0.03125, %v328_v12 }
 0x370   :  { %v336_v15 = vpop.xlane.xlu0 %335 }
 0x371   :  { %711 = vrsqrt.f32 %v347_v13  ;;  %v340_v16 = vmul.f32 %v330_v14, %v330_v14  ;;  %v338_v17 = vmul.f32 0.03125, %v336_v15  ;;  %vm355_vm1 = vweird.f32 %v347_v13 }
 0x372   :  { %v346_v40 = vsub.f32 %v855_v59, %v330_v14 }
 0x373   :  { %v342_v18 = vsub.f32 %v338_v17, %v340_v16 }
 0x375   :  { %v344_v19 = vmax.f32 %v342_v18, 0.0 }
 0x377   :  { %v712_v20 = vpop.eup %711  ;;  %v348_v22 = vadd.f32 1e-05, %v344_v19 }
 0x378   :  { %v350_v21 = vmul.f32 %v712_v20, %v347_v13  ;;  %vm356_vm15 = vweird.f32 %v712_v20 }
 0x379   :  { %713 = vrsqrt.f32 %v348_v22  ;;  %vm357_vm2 = vmor %vm355_vm1, %vm356_vm15  ;;  %vm365_vm4 = vweird.f32 %v348_v22 }
 0x37a   :  { %v351_v23 = vmul.f32 %v712_v20, %v350_v21 }
 0x37c   :  { %v352_v24 = vmul.f32 0.5, %v351_v23 }
 0x37e   :  { %v353_v25 = vsub.f32 1.5, %v352_v24  ;;  %v529_v24 = vperm.slane %v891_v50, 1 }
 0x37f   :  { %v714_v26 = vpop.eup %713 }
 0x380   :  { %v354_v27 = vmul.f32 %v712_v20, %v353_v25  ;;  %v360_v29 = vmul.f32 %v714_v26, %v348_v22  ;;  %vm366_vm3 = vweird.f32 %v714_v26 }
 0x381   :  { %vm367_vm5 = vmor %vm365_vm4, %vm366_vm3 }
 0x382   :  { %v361_v30 = vmul.f32 %v714_v26, %v360_v29  ;;  %v358_v32 = vsel %vm357_vm2, %v712_v20, %v354_v27  ;;  %v532_v29 = vperm.slane %v891_v50, 2 }
 0x383   :  { %v369_v36 = vmul.f32 %v358_v32, %v345_v33 }
 0x384   :  { %v362_v31 = vmul.f32 0.5, %v361_v30 }
 0x385   :  { %v372_v46 = vmul.f32 %v371_v35, %v369_v36 }
 0x386   :  { %v363_v34 = vsub.f32 1.5, %v362_v31 }
 0x387   :  { %v375_v48 = vadd.f32 %v374_v44, %v372_v46 }
 0x388   :  { %v364_v37 = vmul.f32 %v714_v26, %v363_v34 }
 0x38a   :  { %v368_v41 = vsel %vm367_vm5, %v714_v26, %v364_v37 }
 0x38b   :  { %v370_v45 = vmul.f32 %v368_v41, %v346_v40 }
 0x38d   :  { %v373_v47 = vmul.f32 %v371_v35, %v370_v45 }
 0x38f   :  { %v376_v49 = vadd.f32 %v374_v44, %v373_v47 }
 0x391   :  { %v396_v28 = vpack.c.bf16 %v376_v49, %v375_v48 }
 0x393   :  { %454 = vmatmul.bf16.vlgmr.msrb.gmra.mxu1 %v396_v28 }
 0x410   :  { %v455_v51 = vpop.f32.mrf.mxu1 }
 0x411   :  { %v456_v53 = vadd.f32 %v455_v51, %v397_v52 }
 0x413   :  { %v460_v42 = vmul.f32 %v456_v53, %v785_v38 }
 0x418   :  { %v457_v54 = vpop.f32.mrf.mxu1 }
 0x419   :  { %v458_v55 = vadd.f32 %v457_v54, %v397_v52 }
 0x41b   :  { %v461_v56 = vmul.f32 %v458_v55, %v787_v39 }
 0x41d   :  { %v462_v57 = vpack.c.bf16 %v461_v56, %v460_v42 }
 0x41f   :  { %470 = vmatpush.bf16.msrb.mxu3 %v462_v57 }
 0x422   :  { %677 = vmatmul.msk.bf16.vlgmr.msrb.gmra.mxu3 %vm22_vm0, %v794_v43 }
 0x4a5   :  { %v472_v58 = vpop.f32.mrf.mxu3 }
 0x4a6   :  { %v477_v59 = vmul.f32 %v472_v58, %v785_v38 }
 0x4a8   :  { %v479_v60 = vmax.f32 %v477_v59, 0.0 }
 0x4aa   :  { %v481_v61 = vadd.f32 %v479_v60, %v375_v48 }
 0x4ac   :  { %483 = vadd.xlane.f32.xlu1 %v481_v61  ;;  %v489_v62 = vmul.f32 %v481_v61, %v481_v61 }
 0x4ad   :  { %v474_v63 = vpop.f32.mrf.mxu3 }
 0x4ae   :  { %v478_v0 = vmul.f32 %v474_v63, %v787_v39  ;;  %491 = vadd.xlane.f32.xlu0 %v489_v62 }
 0x4b0   :  { %v480_v1 = vmax.f32 %v478_v0, 0.0 }
 0x4b2   :  { %v482_v2 = vadd.f32 %v480_v1, %v376_v49 }
 0x4b4   :  { %485 = vadd.xlane.f32.xlu2 %v482_v2  ;;  %v490_v3 = vmul.f32 %v482_v2, %v482_v2 }
 0x4b6   :  { %493 = vadd.xlane.f32.xlu1 %v490_v3 }
 0x51f   :  { %v484_v4 = vpop.xlane.xlu1 %483 }
 0x520   :  { %v487_v5 = vmul.f32 0.03125, %v484_v4 }
 0x521   :  { %v492_v6 = vpop.xlane.xlu0 %491 }
 0x522   :  { %v497_v43 = vmul.f32 %v487_v5, %v487_v5  ;;  %v495_v7 = vmul.f32 0.03125, %v492_v6  ;;  %v503_v25 = vsub.f32 %v481_v61, %v487_v5 }
 0x524   :  { %v499_v8 = vsub.f32 %v495_v7, %v497_v43 }
 0x526   :  { %v501_v38 = vmax.f32 %v499_v8, 0.0 }
 0x527   :  { %v486_v9 = vpop.xlane.xlu2 %485 }
 0x528   :  { %v505_v10 = vadd.f32 1e-05, %v501_v38  ;;  %v488_v11 = vmul.f32 0.03125, %v486_v9 }
 0x529   :  { %v494_v12 = vpop.xlane.xlu1 %493 }
 0x52a   :  { %715 = vrsqrt.f32 %v505_v10  ;;  %v498_v13 = vmul.f32 %v488_v11, %v488_v11  ;;  %v496_v39 = vmul.f32 0.03125, %v494_v12  ;;  %vm513_vm6 = vweird.f32 %v505_v10 }
 0x52b   :  { %v504_v37 = vsub.f32 %v482_v2, %v488_v11 }
 0x52c   :  { %v500_v14 = vsub.f32 %v496_v39, %v498_v13 }
 0x52e   :  { %v502_v15 = vmax.f32 %v500_v14, 0.0 }
 0x530   :  { %v716_v16 = vpop.eup %715  ;;  %v506_v18 = vadd.f32 1e-05, %v502_v15 }
 0x531   :  { %v508_v17 = vmul.f32 %v716_v16, %v505_v10  ;;  %vm514_vm0 = vweird.f32 %v716_v16 }
 0x532   :  { %717 = vrsqrt.f32 %v506_v18  ;;  %vm515_vm7 = vmor %vm513_vm6, %vm514_vm0  ;;  %vm523_vm9 = vweird.f32 %v506_v18 }
 0x533   :  { %v509_v19 = vmul.f32 %v716_v16, %v508_v17 }
 0x535   :  { %v510_v20 = vmul.f32 0.5, %v509_v19 }
 0x537   :  { %v511_v21 = vsub.f32 1.5, %v510_v20 }
 0x538   :  { %v718_v22 = vpop.eup %717 }
 0x539   :  { %v512_v23 = vmul.f32 %v716_v16, %v511_v21  ;;  %v518_v26 = vmul.f32 %v718_v22, %v506_v18  ;;  %vm524_vm8 = vweird.f32 %v718_v22 }
 0x53a   :  { %vm525_vm10 = vmor %vm523_vm9, %vm524_vm8 }
 0x53b   :  { %v516_v27 = vsel %vm515_vm7, %v716_v16, %v512_v23  ;;  %v519_v31 = vmul.f32 %v718_v22, %v518_v26 }
 0x53c   :  { %v527_v30 = vmul.f32 %v516_v27, %v503_v25 }
 0x53d   :  { %v520_v33 = vmul.f32 0.5, %v519_v31 }
 0x53e   :  { %v530_v32 = vmul.f32 %v529_v24, %v527_v30 }
 0x53f   :  { %v521_v35 = vsub.f32 1.5, %v520_v33 }
 0x540   :  { %v533_v34 = vadd.f32 %v532_v29, %v530_v32 }
 0x541   :  { %v522_v36 = vmul.f32 %v718_v22, %v521_v35 }
 0x542   :  { %535 = vst [vmem:[%s912_s4] sm:$0xff] %v533_v34 }
 0x543   :  { %v526_v40 = vsel %vm525_vm10, %v718_v22, %v522_v36 }
 0x544   :  { %v528_v41 = vmul.f32 %v526_v40, %v504_v37 }
 0x546   :  { %v531_v44 = vmul.f32 %v529_v24, %v528_v41 }
 0x548   :  { %v534_v45 = vadd.f32 %v532_v29, %v531_v44 }
 0x54a   :  { %536 = vst [vmem:[%s912_s4 + $0x8] sm:$0xff] %v534_v45 }

</bundles_post_ra>
